<compile_context>
chip_gen: v7x
topology: tpu7x:2x2x1
jax: 0.10.0
libtpu: 0.0.40
codegen_flags: <defaults>
</compile_context>

<pallas_src>
import math
from functools import lru_cache

import jax
import jax.numpy as jnp
from jax.experimental import pallas as pl
from jax.experimental.pallas import tpu as pltpu


# ----------------------------------------------------------------------------- kernels
def _idft_rows(wr, wi, yr_ref, yi_ref, out_ref, bt, n):
    """Stage 2: out_b = Wr @ Yr_b - Wi @ Yi_b for each of the bt row-blocks.

    No concatenation / no stacked-[[Yr],[Yi]] copies; reads Y directly from VMEM
    scratch via pl.ds row slices inside an unrolled fori_loop (bounded live ranges).
    """
    cdt = wr.dtype

    if bt == 1:
        yr_b = yr_ref[...].astype(cdt)
        yi_b = yi_ref[...].astype(cdt)
        out_ref[...] = (jnp.dot(wr, yr_b, preferred_element_type=jnp.float32)
                        - jnp.dot(wi, yi_b, preferred_element_type=jnp.float32))
        return

    def body(b, carry):
        lo = pl.multiple_of(b * n, n)
        yr_b = yr_ref[pl.ds(lo, n), :].astype(cdt)
        yi_b = yi_ref[pl.ds(lo, n), :].astype(cdt)
        out_ref[pl.ds(lo, n), :] = (
            jnp.dot(wr, yr_b, preferred_element_type=jnp.float32)
            - jnp.dot(wi, yi_b, preferred_element_type=jnp.float32))
        return carry

    jax.lax.fori_loop(0, bt, body, 0, unroll=True)


def _grf2d_kernel_merged(eig2_ref, wa_ref, wb_ref, x_ref, out_ref, yr_ref, yi_ref):
    """Merged-stage-1 variant (2n fits MXU depth).

    x_ref    : (bt*n, 2n)  [Re(C_b) | Im(C_b)] lane-packed per batch row-block (f32)
    eig2_ref : (n, 2n)     [sqrt_eig | sqrt_eig] (f32), broadcast over bt in-kernel
    wa_ref   : (2n, n)     [[Wr], [-Wi]]   (compute dtype)
    wb_ref   : (2n, n)     [[Wi], [ Wr]]   (compute dtype)
    out_ref  : (bt*n, n)   Re(ifft2) row-stacked over the batch tile (f32)
    yr_ref/yi_ref : (bt*n, n) f32 VMEM scratch for the stage-1 result
    """
    n = wa_ref.shape[1]
    bt = x_ref.shape[0] // n
    cdt = wa_ref.dtype

    # Spectral scaling, eig broadcast over the bt row-blocks (no host-side tile).
    if bt == 1:
        xs = (x_ref[...] * eig2_ref[...]).astype(cdt)
    else:
        x3 = x_ref[...].reshape(bt, n, 2 * n) * eig2_ref[...][None]
        xs = x3.reshape(bt * n, 2 * n).astype(cdt)

    # Stage 1 (row-stacked batch, contraction depth 2n):
    #   Yr = Xr@Wr - Xi@Wi = xs @ [[Wr],[-Wi]],  Yi = Xr@Wi + Xi@Wr = xs @ [[Wi],[Wr]]
    yr_ref[...] = jnp.dot(xs, wa_ref[...], preferred_element_type=jnp.float32)
    yi_ref[...] = jnp.dot(xs, wb_ref[...], preferred_element_type=jnp.float32)

    # Stage 2 uses Wr / Wi directly (top halves of WA / WB — static zero-cost slices).
    wr = wa_ref[pl.ds(0, n), :]
    wi = wb_ref[pl.ds(0, n), :]
    _idft_rows(wr, wi, yr_ref, yi_ref, out_ref, bt, n)


def _grf2d_kernel_karatsuba(eig_ref, wr_ref, wi_ref, ws_ref, x_ref, out_ref,
                            yr_ref, yi_ref):
    """Karatsuba-stage-1 variant (large n, K=n already fills the MXU depth).

    NOTE: yi = p3 - p1 - p2 can lose accuracy to cancellation with bf16 operands;
    acceptable at the documented tolerance — pass compute_dtype=float32 if tighter
    accuracy is required.
    """
    n = wr_ref.shape[0]
    bt = x_ref.shape[0] // n
    cdt = wr_ref.dtype

    eig = eig_ref[...]
    x = x_ref[...]
    if bt == 1:
        xr32 = x[:, :n] * eig
        xi32 = x[:, n:] * eig
    else:
        xr32 = (x[:, :n].reshape(bt, n, n) * eig[None]).reshape(bt * n, n)
        xi32 = (x[:, n:].reshape(bt, n, n) * eig[None]).reshape(bt * n, n)
    xr = xr32.astype(cdt)
    xi = xi32.astype(cdt)
    xsum = (xr32 + xi32).astype(cdt)

    p1 = jnp.dot(xr, wr_ref[...], preferred_element_type=jnp.float32)
    p2 = jnp.dot(xi, wi_ref[...], preferred_element_type=jnp.float32)
    p3 = jnp.dot(xsum, ws_ref[...], preferred_element_type=jnp.float32)
    yr_ref[...] = p1 - p2
    yi_ref[...] = p3 - p1 - p2

    _idft_rows(wr_ref[...], wi_ref[...], yr_ref, yi_ref, out_ref, bt, n)


# ------------------------------------------------------------------- host-side helpers
def make_sqrt_eig(n, *, dim=2, alpha=2.0, tau=3.0):
    """Deterministic 'parameter' of the module: sqrt of covariance eigenvalues."""
    sigma = tau ** (0.5 * (2 * alpha - dim))
    h = 1.0 / n
    k = jnp.fft.fftfreq(n, d=h)
    kx, ky = jnp.meshgrid(k, k, indexing="ij")
    sqrt_eig = ((n ** dim) * math.sqrt(2.0) * sigma
                * (4.0 * math.pi ** 2 * (kx ** 2 + ky ** 2) + tau ** 2) ** (-alpha / 2.0))
    sqrt_eig = sqrt_eig.at[0, 0].set(0.0)
    return sqrt_eig.astype(jnp.float32)


def make_idft_matrix(n):
    """W[j,k] = (1/n) exp(2*pi*i*j*k/n), split into real/imag float32 parts."""
    j = jnp.arange(n)[:, None]
    k = jnp.arange(n)[None, :]
    ang = 2.0 * math.pi * ((j * k) % n).astype(jnp.float32) / n
    wr = jnp.cos(ang) / n
    wi = jnp.sin(ang) / n
    return wr.astype(jnp.float32), wi.astype(jnp.float32)


@lru_cache(maxsize=8)
def _grf2d_constants(n, alpha, tau, merged, cdt_name):
    """Cached host constants: sqrt_eig + MXU-ready inverse-DFT matrices."""
    cdt = jnp.dtype(cdt_name)
    sqrt_eig = make_sqrt_eig(n, alpha=alpha, tau=tau)               # (n, n) f32
    wr, wi = make_idft_matrix(n)
    if merged:
        eig2 = jnp.concatenate([sqrt_eig, sqrt_eig], axis=1)        # (n, 2n) f32
        wa = jnp.concatenate([wr, -wi], axis=0).astype(cdt)         # (2n, n)
        wb = jnp.concatenate([wi, wr], axis=0).astype(cdt)          # (2n, n)
        consts = (eig2, wa, wb)
    else:
        consts = (sqrt_eig, wr.astype(cdt), wi.astype(cdt), (wr + wi).astype(cdt))
    return sqrt_eig, consts


def _mxu_depth():
    """Systolic contraction depth of the local TPU's MXU (128: <=v5, 256: v6e/v7x)."""
    try:
        kind = jax.devices()[0].device_kind.lower()
    except Exception:
        return 256
    for tag in ("v2", "v3", "v4", "v5"):
        if tag in kind:
            return 128
    return 256


def _vmem_capacity_bytes():
    try:
        return int(pltpu.get_tpu_info().vmem_capacity_bytes)
    except Exception:
        return 64 * 1024 * 1024        # conservative (v7x per-TC) fallback


def _vmem_estimate(n, bt, merged, itemsize):
    """Rough per-grid-step working-set estimate (constants single-buffered)."""
    rows = bt * n
    if merged:
        const = 4 * (n * 2 * n) + 2 * (2 * n * n) * itemsize
    else:
        const = 4 * (n * n) + 3 * (n * n) * itemsize
    streamed = rows * 2 * n * 4 + rows * n * 4        # coeff block + out block
    scratch = 2 * rows * n * 4                        # yr / yi f32
    interm = 12 * rows * n * 4                        # scaled block, casts, headroom
    return const + 2 * streamed + scratch + interm


def _pick_batch_tile(bsz, n, merged, itemsize, budget):
    """Largest divisor of bsz that (a) keeps >=2 grid steps so v7x's second TC has
    work, (b) keeps the row count bounded, (c) fits the VMEM budget."""
    if n % 8 != 0:
        return bsz                     # single tile: block == full array (8,128) rule
    cap = bsz // 2 if bsz >= 2 else 1
    bt = 1
    for d in range(1, cap + 1):
        if (bsz % d == 0 and d * n <= 1024
                and _vmem_estimate(n, d, merged, itemsize) <= budget):
            bt = d
    return bt


# ----------------------------------------------------------------------------- wrapper
def grf2d_forward(x, key, *, alpha=2.0, tau=3.0, compute_dtype=None):
    """Pallas implementation of GRF2d.forward (normalize=False, smoothing=False)."""
    bsz = int(x.shape[0])
    n = int(max(x.shape[-2], x.shape[-1]))   # module semantics: square (n, n) output

    if compute_dtype is None:
        # Small n is overhead/memory bound: f32 MXU operands cost nothing and avoid
        # bf16 rounding; bf16 (f32 accumulation) for the compute-bound large-n regime.
        compute_dtype = jnp.float32 if n < 128 else jnp.bfloat16
    cdt = jnp.dtype(compute_dtype)

    merged = (2 * n) <= _mxu_depth()          # K=2n fills the MXU -> merged stage 1
    capacity = _vmem_capacity_bytes()
    budget = int(0.8 * capacity)
    bt = _pick_batch_tile(bsz, n, merged, cdt.itemsize, budget)
    rows = bt * n
    num_tiles = bsz // bt

    sqrt_eig, consts = _grf2d_constants(n, float(alpha), float(tau), bool(merged),
                                        cdt.name)

    # iid N(0,1) Fourier coefficients generated directly in the lane-packed layout
    # the kernel consumes: (bsz*n, 2n) = [Re | Im] per batch row-block. No
    # (bsz, 2, n, n) channel slicing / strided HBM copies.
    coeff = jax.random.normal(key, (bsz * n, 2 * n), dtype=jnp.float32)

    kernel = _grf2d_kernel_merged if merged else _grf2d_kernel_karatsuba

    est = _vmem_estimate(n, bt, merged, cdt.itemsize)
    if est <= 12 * 1024 * 1024:
        vmem_limit = None                                   # default scoped limit is fine
    else:
        vmem_limit = int(min(est * 1.25, 0.85 * capacity))  # leave compiler headroom

    const_bytes = sum(int(a.size) * a.dtype.itemsize for a in consts)
    cost = pl.CostEstimate(
        flops=(12 if merged else 10) * bsz * n ** 3,
        transcendentals=0,
        bytes_accessed=4 * bsz * n * n * 3 + const_bytes)

    def _call(single_buffer_consts):
        if single_buffer_consts:
            const_specs = [pl.BlockSpec(tuple(a.shape), lambda g: (0, 0),
                                        pipeline_mode=pl.Buffered(1))
                           for a in consts]
        else:
            const_specs = [pl.BlockSpec(tuple(a.shape), lambda g: (0, 0))
                           for a in consts]
        return pl.pallas_call(
            kernel,
            out_shape=jax.ShapeDtypeStruct((bsz * n, n), jnp.float32),
            grid_spec=pltpu.PrefetchScalarGridSpec(
                num_scalar_prefetch=0,
                grid=(num_tiles,),
                in_specs=const_specs + [pl.BlockSpec((rows, 2 * n), lambda g: (g, 0))],
                out_specs=pl.BlockSpec((rows, n), lambda g: (g, 0)),
                scratch_shapes=[pltpu.VMEM((rows, n), jnp.float32),
                                pltpu.VMEM((rows, n), jnp.float32)],
            ),
            compiler_params=pltpu.CompilerParams(
                dimension_semantics=("parallel",),
                vmem_limit_bytes=vmem_limit),
            cost_estimate=cost,
        )(*consts, coeff)

    try:
        # Preferred: grid-invariant constants single-buffered (halves their VMEM).
        out_flat = _call(True)
    except Exception:
        # Fallback if the Buffered(1) hint is rejected by this JAX/Mosaic version.
        out_flat = _call(False)

    out = out_flat.reshape(bsz, n, n)
    return out, (sqrt_eig, coeff)


# -------------------------------------------------------------------------------- main
if __name__ == "__main__":
    key = jax.random.PRNGKey(0)
    key_x, key_coeff = jax.random.split(key)

    # Input matching the module's expected layout: (bsz, C, n, n) NCHW.
    bsz, C, n = 2, 4, 16
    x = jax.random.normal(key_x, (bsz, C, n, n), dtype=jnp.float32)

    out, (sqrt_eig, coeff) = grf2d_forward(x, key_coeff, alpha=2.0, tau=3.0)
    out = jax.block_until_ready(out)

    # Pure-JAX reference of the same forward (FFT-based) for sanity checking.
    coeff3 = coeff.reshape(bsz, n, 2 * n)
    cr, ci = coeff3[..., :n], coeff3[..., n:]
    ref = jnp.fft.ifftn(sqrt_eig * (cr + 1j * ci), axes=(-2, -1)).real.astype(jnp.float32)

    assert out.shape == (bsz, n, n)
    err = float(jnp.max(jnp.abs(out - ref)))
    scale = float(jnp.max(jnp.abs(ref)))
    assert err <= 3e-2 + 3e-2 * scale, (err, scale)

    print("KERNEL_OK")
</pallas_src>

<mosaic_0001>
module attributes {stable_mosaic.version = 11 : i64} {
  func.func @_grf2d_kernel_merged(%arg0: i32, %arg1: memref<16x32xf32, #tpu.memory_space<vmem>>, %arg2: memref<32x16xf32, #tpu.memory_space<vmem>>, %arg3: memref<32x16xf32, #tpu.memory_space<vmem>>, %arg4: memref<16x32xf32, #tpu.memory_space<vmem>>, %arg5: memref<16x16xf32, #tpu.memory_space<vmem>>, %arg6: memref<16x16xf32, #tpu.memory_space<vmem>>, %arg7: memref<16x16xf32, #tpu.memory_space<vmem>>) attributes {dimension_semantics = [#tpu.dimension_semantics<parallel>], iteration_bounds = array<i64: 2>, scalar_prefetch = 0 : i64, scratch_operands = 2 : i64, tpu.core_type = #tpu.core_type<tc>, window_params = [{pipeline_mode = #tpu.pipeline_mode<synchronous>, transform_indices = @transform_0, window_bounds = array<i64: 16, 32>}, {pipeline_mode = #tpu.pipeline_mode<synchronous>, transform_indices = @transform_1, window_bounds = array<i64: 32, 16>}, {pipeline_mode = #tpu.pipeline_mode<synchronous>, transform_indices = @transform_2, window_bounds = array<i64: 32, 16>}, {transform_indices = @transform_3, window_bounds = array<i64: 16, 32>}, {transform_indices = @transform_4, window_bounds = array<i64: 16, 16>}]} {
    %c0 = arith.constant 0 : index
    %c0_0 = arith.constant 0 : index
    %0 = vector.load %arg4[%c0, %c0_0] : memref<16x32xf32, #tpu.memory_space<vmem>>, vector<16x32xf32>
    %c0_1 = arith.constant 0 : index
    %c0_2 = arith.constant 0 : index
    %1 = vector.load %arg1[%c0_1, %c0_2] : memref<16x32xf32, #tpu.memory_space<vmem>>, vector<16x32xf32>
    %2 = arith.mulf %0, %1 : vector<16x32xf32>
    %c0_3 = arith.constant 0 : index
    %c0_4 = arith.constant 0 : index
    %3 = vector.load %arg2[%c0_3, %c0_4] : memref<32x16xf32, #tpu.memory_space<vmem>>, vector<32x16xf32>
    %cst = arith.constant dense<0.000000e+00> : vector<16x16xf32>
    %4 = tpu.matmul %2, %3, %cst {dimension_numbers = #tpu.dot_dimension_numbers<[1], [0], [0], [1], [0, 0, 1, 1], [], []>} : vector<16x32xf32>, vector<32x16xf32>, vector<16x16xf32> -> vector<16x16xf32>
    %c0_5 = arith.constant 0 : index
    %c0_6 = arith.constant 0 : index
    %5 = vector.load %arg6[%c0_5, %c0_6] : memref<16x16xf32, #tpu.memory_space<vmem>>, vector<16x16xf32>
    tpu.vector_store %arg6[%c0_5, %c0_6], %4 {strides = array<i32>} : memref<16x16xf32, #tpu.memory_space<vmem>>, vector<16x16xf32>,
    %c0_7 = arith.constant 0 : index
    %c0_8 = arith.constant 0 : index
    %6 = vector.load %arg3[%c0_7, %c0_8] : memref<32x16xf32, #tpu.memory_space<vmem>>, vector<32x16xf32>
    %cst_9 = arith.constant dense<0.000000e+00> : vector<16x16xf32>
    %7 = tpu.matmul %2, %6, %cst_9 {dimension_numbers = #tpu.dot_dimension_numbers<[1], [0], [0], [1], [0, 0, 1, 1], [], []>} : vector<16x32xf32>, vector<32x16xf32>, vector<16x16xf32> -> vector<16x16xf32>
    %c0_10 = arith.constant 0 : index
    %c0_11 = arith.constant 0 : index
    %8 = vector.load %arg7[%c0_10, %c0_11] : memref<16x16xf32, #tpu.memory_space<vmem>>, vector<16x16xf32>
    tpu.vector_store %arg7[%c0_10, %c0_11], %7 {strides = array<i32>} : memref<16x16xf32, #tpu.memory_space<vmem>>, vector<16x16xf32>,
    %c0_12 = arith.constant 0 : index
    %c0_13 = arith.constant 0 : index
    %9 = vector.load %arg2[%c0_12, %c0_13] : memref<32x16xf32, #tpu.memory_space<vmem>>, vector<16x16xf32>
    %c0_14 = arith.constant 0 : index
    %c0_15 = arith.constant 0 : index
    %10 = vector.load %arg3[%c0_14, %c0_15] : memref<32x16xf32, #tpu.memory_space<vmem>>, vector<16x16xf32>
    %c0_16 = arith.constant 0 : index
    %c0_17 = arith.constant 0 : index
    %11 = vector.load %arg6[%c0_16, %c0_17] : memref<16x16xf32, #tpu.memory_space<vmem>>, vector<16x16xf32>
    %c0_18 = arith.constant 0 : index
    %c0_19 = arith.constant 0 : index
    %12 = vector.load %arg7[%c0_18, %c0_19] : memref<16x16xf32, #tpu.memory_space<vmem>>, vector<16x16xf32>
    %cst_20 = arith.constant dense<0.000000e+00> : vector<16x16xf32>
    %13 = tpu.matmul %9, %11, %cst_20 {dimension_numbers = #tpu.dot_dimension_numbers<[1], [0], [0], [1], [0, 0, 1, 1], [], []>} : vector<16x16xf32>, vector<16x16xf32>, vector<16x16xf32> -> vector<16x16xf32>
    %cst_21 = arith.constant dense<0.000000e+00> : vector<16x16xf32>
    %14 = tpu.matmul %10, %12, %cst_21 {dimension_numbers = #tpu.dot_dimension_numbers<[1], [0], [0], [1], [0, 0, 1, 1], [], []>} : vector<16x16xf32>, vector<16x16xf32>, vector<16x16xf32> -> vector<16x16xf32>
    %15 = arith.subf %13, %14 : vector<16x16xf32>
    %c0_22 = arith.constant 0 : index
    %c0_23 = arith.constant 0 : index
    %16 = vector.load %arg5[%c0_22, %c0_23] : memref<16x16xf32, #tpu.memory_space<vmem>>, vector<16x16xf32>
    tpu.vector_store %arg5[%c0_22, %c0_23], %15 {strides = array<i32>} : memref<16x16xf32, #tpu.memory_space<vmem>>, vector<16x16xf32>,
    return
  }
  func.func @transform_0(%arg0: i32) -> (i32, i32) {
    %c0_i32 = arith.constant 0 : i32
    %c0_i32_0 = arith.constant 0 : i32
    %c0_i32_1 = arith.constant 0 : i32
    return %c0_i32, %c0_i32_0 : i32, i32
  }
  func.func @transform_1(%arg0: i32) -> (i32, i32) {
    %c0_i32 = arith.constant 0 : i32
    %c0_i32_0 = arith.constant 0 : i32
    %c0_i32_1 = arith.constant 0 : i32
    return %c0_i32, %c0_i32_0 : i32, i32
  }
  func.func @transform_2(%arg0: i32) -> (i32, i32) {
    %c0_i32 = arith.constant 0 : i32
    %c0_i32_0 = arith.constant 0 : i32
    %c0_i32_1 = arith.constant 0 : i32
    return %c0_i32, %c0_i32_0 : i32, i32
  }
  func.func @transform_3(%arg0: i32) -> (i32, i32) {
    %c0_i32 = arith.constant 0 : i32
    %c0_i32_0 = arith.constant 0 : i32
    return %arg0, %c0_i32 : i32, i32
  }
  func.func @transform_4(%arg0: i32) -> (i32, i32) {
    %c0_i32 = arith.constant 0 : i32
    %c0_i32_0 = arith.constant 0 : i32
    return %arg0, %c0_i32 : i32, i32
  }
}

module attributes {stable_mosaic.version = 11 : i64} {
  func.func @_grf2d_kernel_merged(%arg0: i32, %arg1: memref<16x32xf32, #tpu.memory_space<vmem>>, %arg2: memref<32x16xf32, #tpu.memory_space<vmem>>, %arg3: memref<32x16xf32, #tpu.memory_space<vmem>>, %arg4: memref<16x32xf32, #tpu.memory_space<vmem>>, %arg5: memref<16x16xf32, #tpu.memory_space<vmem>>, %arg6: memref<16x16xf32, #tpu.memory_space<vmem>>, %arg7: memref<16x16xf32, #tpu.memory_space<vmem>>) attributes {dimension_semantics = [#tpu.dimension_semantics<parallel>], iteration_bounds = array<i64: 2>, scalar_prefetch = 0 : i64, scratch_operands = 2 : i64, tpu.core_type = #tpu.core_type<tc>, window_params = [{pipeline_mode = #tpu.pipeline_mode<synchronous>, transform_indices = @transform_0, window_bounds = array<i64: 16, 32>}, {pipeline_mode = #tpu.pipeline_mode<synchronous>, transform_indices = @transform_1, window_bounds = array<i64: 32, 16>}, {pipeline_mode = #tpu.pipeline_mode<synchronous>, transform_indices = @transform_2, window_bounds = array<i64: 32, 16>}, {transform_indices = @transform_3, window_bounds = array<i64: 16, 32>}, {transform_indices = @transform_4, window_bounds = array<i64: 16, 16>}]} {
    %c0 = arith.constant 0 : index
    %c0_0 = arith.constant 0 : index
    %0 = vector.load %arg4[%c0, %c0_0] : memref<16x32xf32, #tpu.memory_space<vmem>>, vector<16x32xf32>
    %c0_1 = arith.constant 0 : index
    %c0_2 = arith.constant 0 : index
    %1 = vector.load %arg1[%c0_1, %c0_2] : memref<16x32xf32, #tpu.memory_space<vmem>>, vector<16x32xf32>
    %2 = arith.mulf %0, %1 : vector<16x32xf32>
    %c0_3 = arith.constant 0 : index
    %c0_4 = arith.constant 0 : index
    %3 = vector.load %arg2[%c0_3, %c0_4] : memref<32x16xf32, #tpu.memory_space<vmem>>, vector<32x16xf32>
    %cst = arith.constant dense<0.000000e+00> : vector<16x16xf32>
    %4 = tpu.matmul %2, %3, %cst {dimension_numbers = #tpu.dot_dimension_numbers<[1], [0], [0], [1], [0, 0, 1, 1], [], []>} : vector<16x32xf32>, vector<32x16xf32>, vector<16x16xf32> -> vector<16x16xf32>
    %c0_5 = arith.constant 0 : index
    %c0_6 = arith.constant 0 : index
    %5 = vector.load %arg6[%c0_5, %c0_6] : memref<16x16xf32, #tpu.memory_space<vmem>>, vector<16x16xf32>
    tpu.vector_store %arg6[%c0_5, %c0_6], %4 {strides = array<i32>} : memref<16x16xf32, #tpu.memory_space<vmem>>, vector<16x16xf32>,
    %c0_7 = arith.constant 0 : index
    %c0_8 = arith.constant 0 : index
    %6 = vector.load %arg3[%c0_7, %c0_8] : memref<32x16xf32, #tpu.memory_space<vmem>>, vector<32x16xf32>
    %cst_9 = arith.constant dense<0.000000e+00> : vector<16x16xf32>
    %7 = tpu.matmul %2, %6, %cst_9 {dimension_numbers = #tpu.dot_dimension_numbers<[1], [0], [0], [1], [0, 0, 1, 1], [], []>} : vector<16x32xf32>, vector<32x16xf32>, vector<16x16xf32> -> vector<16x16xf32>
    %c0_10 = arith.constant 0 : index
    %c0_11 = arith.constant 0 : index
    %8 = vector.load %arg7[%c0_10, %c0_11] : memref<16x16xf32, #tpu.memory_space<vmem>>, vector<16x16xf32>
    tpu.vector_store %arg7[%c0_10, %c0_11], %7 {strides = array<i32>} : memref<16x16xf32, #tpu.memory_space<vmem>>, vector<16x16xf32>,
    %c0_12 = arith.constant 0 : index
    %c0_13 = arith.constant 0 : index
    %9 = vector.load %arg2[%c0_12, %c0_13] : memref<32x16xf32, #tpu.memory_space<vmem>>, vector<16x16xf32>
    %c0_14 = arith.constant 0 : index
    %c0_15 = arith.constant 0 : index
    %10 = vector.load %arg3[%c0_14, %c0_15] : memref<32x16xf32, #tpu.memory_space<vmem>>, vector<16x16xf32>
    %c0_16 = arith.constant 0 : index
    %c0_17 = arith.constant 0 : index
    %11 = vector.load %arg6[%c0_16, %c0_17] : memref<16x16xf32, #tpu.memory_space<vmem>>, vector<16x16xf32>
    %c0_18 = arith.constant 0 : index
    %c0_19 = arith.constant 0 : index
    %12 = vector.load %arg7[%c0_18, %c0_19] : memref<16x16xf32, #tpu.memory_space<vmem>>, vector<16x16xf32>
    %cst_20 = arith.constant dense<0.000000e+00> : vector<16x16xf32>
    %13 = tpu.matmul %9, %11, %cst_20 {dimension_numbers = #tpu.dot_dimension_numbers<[1], [0], [0], [1], [0, 0, 1, 1], [], []>} : vector<16x16xf32>, vector<16x16xf32>, vector<16x16xf32> -> vector<16x16xf32>
    %cst_21 = arith.constant dense<0.000000e+00> : vector<16x16xf32>
    %14 = tpu.matmul %10, %12, %cst_21 {dimension_numbers = #tpu.dot_dimension_numbers<[1], [0], [0], [1], [0, 0, 1, 1], [], []>} : vector<16x16xf32>, vector<16x16xf32>, vector<16x16xf32> -> vector<16x16xf32>
    %15 = arith.subf %13, %14 : vector<16x16xf32>
    %c0_22 = arith.constant 0 : index
    %c0_23 = arith.constant 0 : index
    %16 = vector.load %arg5[%c0_22, %c0_23] : memref<16x16xf32, #tpu.memory_space<vmem>>, vector<16x16xf32>
    tpu.vector_store %arg5[%c0_22, %c0_23], %15 {strides = array<i32>} : memref<16x16xf32, #tpu.memory_space<vmem>>, vector<16x16xf32>,
    return
  }
  func.func @transform_0(%arg0: i32) -> (i32, i32) {
    %c0_i32 = arith.constant 0 : i32
    %c0_i32_0 = arith.constant 0 : i32
    %c0_i32_1 = arith.constant 0 : i32
    return %c0_i32, %c0_i32_0 : i32, i32
  }
  func.func @transform_1(%arg0: i32) -> (i32, i32) {
    %c0_i32 = arith.constant 0 : i32
    %c0_i32_0 = arith.constant 0 : i32
    %c0_i32_1 = arith.constant 0 : i32
    return %c0_i32, %c0_i32_0 : i32, i32
  }
  func.func @transform_2(%arg0: i32) -> (i32, i32) {
    %c0_i32 = arith.constant 0 : i32
    %c0_i32_0 = arith.constant 0 : i32
    %c0_i32_1 = arith.constant 0 : i32
    return %c0_i32, %c0_i32_0 : i32, i32
  }
  func.func @transform_3(%arg0: i32) -> (i32, i32) {
    %c0_i32 = arith.constant 0 : i32
    %c0_i32_0 = arith.constant 0 : i32
    return %arg0, %c0_i32 : i32, i32
  }
  func.func @transform_4(%arg0: i32) -> (i32, i32) {
    %c0_i32 = arith.constant 0 : i32
    %c0_i32_0 = arith.constant 0 : i32
    return %arg0, %c0_i32 : i32, i32
  }
}

</mosaic_0001>

<bundles_post_ra>
// kernel: tpu_custom_call.1
= control target key start
LH: loop header
LB: loop body
LE: loop exit
PB: predicated region body
PF: predicated region fallthrough
CT: control target
= control target key end

     0   :  { %s747_s15 = smov 0   ;;  %s811_s0 = inlined_call_operand.vmem [shape: f32[16,32], index: 0, kind: input, shape index: {}]   ;;  %s812_s1 = inlined_call_operand.vmem [shape: f32[32,16], index: 1, kind: input, shape index: {}]   ;;  %s813_s2 = inlined_call_operand.vmem [shape: f32[32,16], index: 2, kind: input, shape index: {}]   ;;  %s814_s3 = inlined_call_operand.vmem [shape: f32[32,32], index: 3, kind: input, shape index: {}]   ;;  %s815_s4 = inlined_call_operand.vmem [shape: f32[32,16], index: 4, kind: output, shape index: {}]  }
   0x1 LB: > { %s607_s16 = sadd.s32 4294967295, %s720_s15   ;;  %p611_p0 = scmp.ge.s32.totalorder %s720_s15, 1  ;;  %s720_s15 = sphi %s747_s15, %s14_s15  }
   0x2   : > { %p163_p1 = scmp.lt.s32.totalorder %s720_s15, 3 }
   0x4   : > { %p164_p2 = pnand %p611_p0, %p163_p1 }
   0x5   : > { %v207_v0 = vld [vmem:[%s812_s1] sm:$0xff] (!%p164_p2)  ;;  %v208_v1 = vld [vmem:[%s812_s1 + $0x8] sm:$0xff] (!%p164_p2)  ;;  %s612_s23 = sshll.u32 (!%p164_p2), %s607_s16, 1  ;;  %v209_v5 = vld [vmem:[%s812_s1 + $0x10] sm:$0xff] (!%p164_p2)  ;;  %vm211_vm0 = vcmask (!%p164_p2), 261120   ;;  %vm293_vm1 = vcmask (!%p164_p2), 130048  }
   0x6   : > { %167 = sbr.rel (%p164_p2) target bundleno = 463 (0x1cf), region = 36  ;;  %v296_v2 = vld [vmem:[%s813_s2] sm:$0xff] (!%p164_p2)  ;;  %v682_v3 = vpack.c.bf16 (!%p164_p2), %v208_v1, %v207_v0  ;;  %v297_v4 = vld [vmem:[%s813_s2 + $0x8] sm:$0xff] (!%p164_p2)  ;;  %v210_v6 = vld [vmem:[%s812_s1 + $0x18] sm:$0xff] (!%p164_p2)  ;;  %p190_p3 = scmp.lt.s32.totalorder (!%p164_p2), %s612_s23, 3 }
   0x7   : > { %v690_v7 = vpack.c.bf16 (!%p164_p2), %v297_v4, %v296_v2  ;;  %v686_v8 = vpack.c.bf16 (!%p164_p2), %v210_v6, %v209_v5  ;;  %v298_v9 = vld [vmem:[%s813_s2 + $0x10] sm:$0xff] (!%p164_p2)  ;;  %v299_v10 = vld [vmem:[%s813_s2 + $0x18] sm:$0xff] (!%p164_p2)  ;;  %v203_v12 = vld [vmem:[%s811_s0] sm:$0xff] (!%p164_p2) }
   0x8   : > { %683 = vmatprep.subr.bf16.mxu0 (!%p164_p2), %v682_v3  ;;  %v694_v11 = vpack.c.bf16 (!%p164_p2), %v299_v10, %v298_v9  ;;  %v204_v13 = vld [vmem:[%s811_s0 + $0x8] sm:$0xff] (!%p164_p2) }
   0x9   : > { %691 = vmatprep.subr.bf16.mxu1 (!%p164_p2), %v690_v7  ;;  %685 = vmatpush3.bf16.msra.mxu0 (!%p164_p2), %v682_v3 }
   0xa   : > { %693 = vmatpush3.bf16.msra.mxu1 (!%p164_p2), %v690_v7  ;;  %687 = vmatprep.subr.bf16.mxu0 (!%p164_p2), %v686_v8 }
   0xb   : > { %695 = vmatprep.subr.bf16.mxu1 (!%p164_p2), %v694_v11 }
   0xd   : > { %s817_s23 = smov (!%p190_p3, %s612_s23), 3  ;;  %689 = vmatpush3.bf16.msra.mxu0 %v686_v8 }
   0xe   : > { %s613_s8 = sshll.u32 %s817_s23, 3  ;;  %697 = vmatpush3.bf16.msra.mxu1 %v694_v11 }
   0xf   : > { %s193_s16 = scalar_lea.vmem %s814_s3, %s613_s8  ;;  %s199_s19 = scalar_lea.vmem %s815_s4, %s613_s8 }
  0x10   : > { %v201_v14 = vld [vmem:[%s193_s16] sm:$0xff]  ;;  %v202_v15 = vld [vmem:[%s193_s16 + $0x8] sm:$0xff] }
  0x11   : > { %v205_v16 = vmul.f32 %v203_v12, %v201_v14  ;;  %v206_v17 = vmul.f32 %v204_v13, %v202_v15 }
  0x13   : > { %654 = vmatprep.mubr.msk.f32.mxu0 %vm211_vm0, %v205_v16  ;;  %665 = vmatprep.mubr.msk.f32.mxu1 %vm211_vm0, %v205_v16 }
  0x14   : > { %655 = vmatmul.mubr.msk.f32.vlgmr.msra.gmra.mrb[0].mxu0 %vm211_vm0, %v206_v17  ;;  %666 = vmatmul.mubr.msk.f32.vlgmr.msra.gmra.mrb[0].mxu1 %vm211_vm0, %v206_v17 }
  0x15   : > { %672 = vmatprep.mubr.msk.f32.mxu0 %vm293_vm1, %v207_v0  ;;  %679 = vmatprep.mubr.msk.f32.mxu1 %vm293_vm1, %v296_v2 }
  0xe7   : > { %v656_v18 = vpop.f32.mrb[0].mxu0  ;;  %v667_v19 = vpop.f32.mrb[0].mxu1 }
  0xe8   : > { %295 = vst.msk [vmem:[#allocation2 + $0x8] sm:$0xff] %vm293_vm1, %v656_v18  ;;  %v284_v20 = vpop.f32.mrb[1].mxu0  ;;  %376 = vst.msk [vmem:[#allocation3 + $0x8] sm:$0xff] %vm293_vm1, %v667_v19  ;;  %v366_v21 = vpop.f32.mrb[1].mxu1 }
  0xe9   : > { %294 = vst.msk [vmem:[#allocation2] sm:$0xff] %vm293_vm1, %v284_v20  ;;  %375 = vst.msk [vmem:[#allocation3] sm:$0xff] %vm293_vm1, %v366_v21 }
  0xef   : > { %v382_v22 = vld [vmem:[#allocation2 + $0x8] sm:$0xff]  ;;  %v384_v24 = vld [vmem:[#allocation3 + $0x8] sm:$0xff] }
  0xf0   : > { %v381_v23 = vld [vmem:[#allocation2] sm:$0xff]  ;;  %v383_v26 = vld [vmem:[#allocation3] sm:$0xff] }
  0xf1   : > { %v698_v25 = vpack.c.bf16 %v382_v22, %v381_v23  ;;  %v702_v27 = vpack.c.bf16 %v384_v24, %v383_v26 }
  0xf3   : > { %699 = vmatprep.subr.bf16.mxu0 %v698_v25  ;;  %703 = vmatprep.subr.bf16.mxu1 %v702_v27 }
  0xf4   : > { %701 = vmatpush3.bf16.msra.mxu0 %v698_v25  ;;  %705 = vmatpush3.bf16.msra.mxu1 %v702_v27 }
  0xf7   : > { %673 = vmatmul.mubr.msk.f32.vlgmr.msra.gmra.mrb[2].mxu0 %vm293_vm1, %v208_v1  ;;  %680 = vmatmul.mubr.msk.f32.vlgmr.msra.gmra.mrb[2].mxu1 %vm293_vm1, %v297_v4 }
 0x1ca   : > { %v674_v28 = vpop.f32.mrb[2].mxu0  ;;  %v681_v29 = vpop.f32.mrb[2].mxu1 }
 0x1cb   : > { %v457_v30 = vpop.f32.mrb[3].mxu0  ;;  %v548_v31 = vsub.f32 %v674_v28, %v681_v29  ;;  %v538_v32 = vpop.f32.mrb[3].mxu1 }
 0x1cc   : > { %v547_v33 = vsub.f32 %v457_v30, %v538_v32 }
 0x1cd   : > { %550 = vst.msk [vmem:[%s199_s19 + $0x8] sm:$0xff] %vm293_vm1, %v548_v31 }
 0x1ce   : > { %549 = vst.msk [vmem:[%s199_s19] sm:$0xff] %vm293_vm1, %v547_v33 }
 0x1cf PF: > { %s14_s15 = sadd.s32 1, %s720_s15  }
 0x1d0   : > { %p11_p4 = scmp.ge.s32.totalorder %s14_s15, 4  }
 0x1d2   :  { %13 = sbr.rel (!%p11_p4) target bundleno = 1 (0x1), region = 66 }

// kernel: tpu_custom_call.1
= control target key start
LH: loop header
LB: loop body
LE: loop exit
PB: predicated region body
PF: predicated region fallthrough
CT: control target
= control target key end

     0   :  { %s747_s15 = smov 0   ;;  %s811_s0 = inlined_call_operand.vmem [shape: f32[16,32], index: 0, kind: input, shape index: {}]   ;;  %s812_s1 = inlined_call_operand.vmem [shape: f32[32,16], index: 1, kind: input, shape index: {}]   ;;  %s813_s2 = inlined_call_operand.vmem [shape: f32[32,16], index: 2, kind: input, shape index: {}]   ;;  %s814_s3 = inlined_call_operand.vmem [shape: f32[32,32], index: 3, kind: input, shape index: {}]   ;;  %s815_s4 = inlined_call_operand.vmem [shape: f32[32,16], index: 4, kind: output, shape index: {}]  }
   0x1 LB: > { %s607_s16 = sadd.s32 4294967295, %s720_s15   ;;  %p611_p0 = scmp.ge.s32.totalorder %s720_s15, 1  ;;  %s720_s15 = sphi %s747_s15, %s14_s15  }
   0x2   : > { %p163_p1 = scmp.lt.s32.totalorder %s720_s15, 3 }
   0x4   : > { %p164_p2 = pnand %p611_p0, %p163_p1 }
   0x5   : > { %v207_v0 = vld [vmem:[%s812_s1] sm:$0xff] (!%p164_p2)  ;;  %v208_v1 = vld [vmem:[%s812_s1 + $0x8] sm:$0xff] (!%p164_p2)  ;;  %s612_s23 = sshll.u32 (!%p164_p2), %s607_s16, 1  ;;  %v209_v5 = vld [vmem:[%s812_s1 + $0x10] sm:$0xff] (!%p164_p2)  ;;  %vm211_vm0 = vcmask (!%p164_p2), 261120   ;;  %vm293_vm1 = vcmask (!%p164_p2), 130048  }
   0x6   : > { %167 = sbr.rel (%p164_p2) target bundleno = 463 (0x1cf), region = 36  ;;  %v296_v2 = vld [vmem:[%s813_s2] sm:$0xff] (!%p164_p2)  ;;  %v682_v3 = vpack.c.bf16 (!%p164_p2), %v208_v1, %v207_v0  ;;  %v297_v4 = vld [vmem:[%s813_s2 + $0x8] sm:$0xff] (!%p164_p2)  ;;  %v210_v6 = vld [vmem:[%s812_s1 + $0x18] sm:$0xff] (!%p164_p2)  ;;  %p190_p3 = scmp.lt.s32.totalorder (!%p164_p2), %s612_s23, 3 }
   0x7   : > { %v690_v7 = vpack.c.bf16 (!%p164_p2), %v297_v4, %v296_v2  ;;  %v686_v8 = vpack.c.bf16 (!%p164_p2), %v210_v6, %v209_v5  ;;  %v298_v9 = vld [vmem:[%s813_s2 + $0x10] sm:$0xff] (!%p164_p2)  ;;  %v299_v10 = vld [vmem:[%s813_s2 + $0x18] sm:$0xff] (!%p164_p2)  ;;  %v203_v12 = vld [vmem:[%s811_s0] sm:$0xff] (!%p164_p2) }
   0x8   : > { %683 = vmatprep.subr.bf16.mxu0 (!%p164_p2), %v682_v3  ;;  %v694_v11 = vpack.c.bf16 (!%p164_p2), %v299_v10, %v298_v9  ;;  %v204_v13 = vld [vmem:[%s811_s0 + $0x8] sm:$0xff] (!%p164_p2) }
   0x9   : > { %691 = vmatprep.subr.bf16.mxu1 (!%p164_p2), %v690_v7  ;;  %685 = vmatpush3.bf16.msra.mxu0 (!%p164_p2), %v682_v3 }
   0xa   : > { %693 = vmatpush3.bf16.msra.mxu1 (!%p164_p2), %v690_v7  ;;  %687 = vmatprep.subr.bf16.mxu0 (!%p164_p2), %v686_v8 }
   0xb   : > { %695 = vmatprep.subr.bf16.mxu1 (!%p164_p2), %v694_v11 }
   0xd   : > { %s817_s23 = smov (!%p190_p3, %s612_s23), 3  ;;  %689 = vmatpush3.bf16.msra.mxu0 %v686_v8 }
   0xe   : > { %s613_s8 = sshll.u32 %s817_s23, 3  ;;  %697 = vmatpush3.bf16.msra.mxu1 %v694_v11 }
   0xf   : > { %s193_s16 = scalar_lea.vmem %s814_s3, %s613_s8  ;;  %s199_s19 = scalar_lea.vmem %s815_s4, %s613_s8 }
  0x10   : > { %v201_v14 = vld [vmem:[%s193_s16] sm:$0xff]  ;;  %v202_v15 = vld [vmem:[%s193_s16 + $0x8] sm:$0xff] }
  0x11   : > { %v205_v16 = vmul.f32 %v203_v12, %v201_v14  ;;  %v206_v17 = vmul.f32 %v204_v13, %v202_v15 }
  0x13   : > { %654 = vmatprep.mubr.msk.f32.mxu0 %vm211_vm0, %v205_v16  ;;  %665 = vmatprep.mubr.msk.f32.mxu1 %vm211_vm0, %v205_v16 }
  0x14   : > { %655 = vmatmul.mubr.msk.f32.vlgmr.msra.gmra.mrb[0].mxu0 %vm211_vm0, %v206_v17  ;;  %666 = vmatmul.mubr.msk.f32.vlgmr.msra.gmra.mrb[0].mxu1 %vm211_vm0, %v206_v17 }
  0x15   : > { %672 = vmatprep.mubr.msk.f32.mxu0 %vm293_vm1, %v207_v0  ;;  %679 = vmatprep.mubr.msk.f32.mxu1 %vm293_vm1, %v296_v2 }
  0xe7   : > { %v656_v18 = vpop.f32.mrb[0].mxu0  ;;  %v667_v19 = vpop.f32.mrb[0].mxu1 }
  0xe8   : > { %295 = vst.msk [vmem:[#allocation2 + $0x8] sm:$0xff] %vm293_vm1, %v656_v18  ;;  %v284_v20 = vpop.f32.mrb[1].mxu0  ;;  %376 = vst.msk [vmem:[#allocation3 + $0x8] sm:$0xff] %vm293_vm1, %v667_v19  ;;  %v366_v21 = vpop.f32.mrb[1].mxu1 }
  0xe9   : > { %294 = vst.msk [vmem:[#allocation2] sm:$0xff] %vm293_vm1, %v284_v20  ;;  %375 = vst.msk [vmem:[#allocation3] sm:$0xff] %vm293_vm1, %v366_v21 }
  0xef   : > { %v382_v22 = vld [vmem:[#allocation2 + $0x8] sm:$0xff]  ;;  %v384_v24 = vld [vmem:[#allocation3 + $0x8] sm:$0xff] }
  0xf0   : > { %v381_v23 = vld [vmem:[#allocation2] sm:$0xff]  ;;  %v383_v26 = vld [vmem:[#allocation3] sm:$0xff] }
  0xf1   : > { %v698_v25 = vpack.c.bf16 %v382_v22, %v381_v23  ;;  %v702_v27 = vpack.c.bf16 %v384_v24, %v383_v26 }
  0xf3   : > { %699 = vmatprep.subr.bf16.mxu0 %v698_v25  ;;  %703 = vmatprep.subr.bf16.mxu1 %v702_v27 }
  0xf4   : > { %701 = vmatpush3.bf16.msra.mxu0 %v698_v25  ;;  %705 = vmatpush3.bf16.msra.mxu1 %v702_v27 }
  0xf7   : > { %673 = vmatmul.mubr.msk.f32.vlgmr.msra.gmra.mrb[2].mxu0 %vm293_vm1, %v208_v1  ;;  %680 = vmatmul.mubr.msk.f32.vlgmr.msra.gmra.mrb[2].mxu1 %vm293_vm1, %v297_v4 }
 0x1ca   : > { %v674_v28 = vpop.f32.mrb[2].mxu0  ;;  %v681_v29 = vpop.f32.mrb[2].mxu1 }
 0x1cb   : > { %v457_v30 = vpop.f32.mrb[3].mxu0  ;;  %v548_v31 = vsub.f32 %v674_v28, %v681_v29  ;;  %v538_v32 = vpop.f32.mrb[3].mxu1 }
 0x1cc   : > { %v547_v33 = vsub.f32 %v457_v30, %v538_v32 }
 0x1cd   : > { %550 = vst.msk [vmem:[%s199_s19 + $0x8] sm:$0xff] %vm293_vm1, %v548_v31 }
 0x1ce   : > { %549 = vst.msk [vmem:[%s199_s19] sm:$0xff] %vm293_vm1, %v547_v33 }
 0x1cf PF: > { %s14_s15 = sadd.s32 1, %s720_s15  }
 0x1d0   : > { %p11_p4 = scmp.ge.s32.totalorder %s14_s15, 4  }
 0x1d2   :  { %13 = sbr.rel (!%p11_p4) target bundleno = 1 (0x1), region = 66 }

</bundles_post_ra>
